<compile_context>
chip_gen: v7x
topology: tpu7x:2x2x1
jax: 0.10.0
libtpu: 0.0.40
codegen_flags: <defaults>
</compile_context>

<pallas_src>
import functools

import jax
import jax.numpy as jnp
from jax import lax
from jax.experimental import pallas as pl
from jax.experimental.pallas import tpu as pltpu

NEG_SLOPE = 0.2  # LeakyReLU slope of the concrete mapping MLP


# ----------------------------- hardware helpers --------------------------------


@functools.lru_cache(maxsize=None)
def _vmem_capacity_bytes():
    try:
        return int(pltpu.get_tpu_info().vmem_capacity_bytes)
    except Exception:
        return 64 * 1024 * 1024  # conservative (v7x per-TC VMEM)


def _vmem_limit_bytes():
    cap = _vmem_capacity_bytes()
    return int(min(max(int(0.85 * cap), 32 * 1024 * 1024), 128 * 1024 * 1024))


def _choose_batch_tile(batch, bytes_per_row, fixed_bytes=0):
    """Largest batch tile whose double-buffered rows fit ~80% of VMEM."""
    budget = int(0.80 * _vmem_capacity_bytes()) - fixed_bytes
    for tb in (2048, 1024, 512, 256, 128):
        if batch <= tb:
            continue
        if 2 * tb * bytes_per_row <= budget:
            return tb
    if batch > 128:
        return 128
    return batch  # single tile; block_shape == full array dims, always legal


def _pad_rows(x, rows):
    if rows == x.shape[0]:
        return x
    pad = [(0, rows - x.shape[0])] + [(0, 0)] * (x.ndim - 1)
    return jnp.pad(x, pad)


def _default_mxu_dtype(z_dim, hidden, w_dim):
    # bf16 MXU operands run at native MXU rate on v5e/v6e/v7x; keep f32 for the
    # tiny demo dims so the numerical reference checks are tight.
    return jnp.bfloat16 if min(z_dim, hidden, w_dim) >= 128 else jnp.float32


# ----------------------------- kernel bodies -----------------------------------


def _mapping_mlp(z, w1, b1, w2, b2, mxu_dtype):
    """2-layer mapping MLP on the MXU, f32 accumulation."""
    if mxu_dtype != jnp.float32:
        z, w1, w2 = z.astype(mxu_dtype), w1.astype(mxu_dtype), w2.astype(mxu_dtype)
    h = jnp.dot(z, w1, preferred_element_type=jnp.float32) + b1
    h = jnp.where(h >= 0.0, h, NEG_SLOPE * h)  # LeakyReLU (VPU, f32)
    if mxu_dtype != jnp.float32:
        h = h.astype(mxu_dtype)
    return jnp.dot(h, w2, preferred_element_type=jnp.float32) + b2


def _mapping_eval_kernel(z_ref, w1_ref, b1_ref, w2_ref, b2_ref, *rest,
                         psi, num_styles, w_dim, mxu_dtype):
    """Fused: mapping MLP -> (optional) truncation lerp -> per-style slice stores."""
    if psi != 1.0:
        wavg_ref, out_ref = rest
    else:
        (out_ref,) = rest
    w = _mapping_mlp(z_ref[...], w1_ref[...], b1_ref[...], w2_ref[...], b2_ref[...],
                     mxu_dtype)                                    # (tb, D) f32
    if psi != 1.0:  # compile-time constant; lerp once on (tb, D), not on the slab
        wavg = wavg_ref[...]                                       # (1, D) broadcasts
        w = wavg + psi * (w - wavg)
    w_cast = w.astype(out_ref.dtype)
    for s in range(num_styles):                                    # N slice stores
        out_ref[:, s * w_dim:(s + 1) * w_dim] = w_cast


def _mapping_train_kernel(z_ref, w1_ref, b1_ref, w2_ref, b2_ref,
                          w_out_ref, psum_ref,
                          *, num_styles, w_dim, batch, tile, mask_pad, mxu_dtype):
    """Fused: mapping MLP -> style slab + per-tile partial batch sum.

    Each grid step writes its own partial-sum block, so the batch axis can be
    'parallel' (megacore-friendly on v7x); the final mean + decay lerp is plain
    JAX on a (1, D) vector in the wrapper."""
    w = _mapping_mlp(z_ref[...], w1_ref[...], b1_ref[...], w2_ref[...], b2_ref[...],
                     mxu_dtype)                                    # (tb, D) f32
    w_cast = w.astype(w_out_ref.dtype)
    for s in range(num_styles):
        w_out_ref[:, s * w_dim:(s + 1) * w_dim] = w_cast
    if mask_pad:  # zero out zero-padded rows so they don't pollute the batch mean
        row = pl.program_id(0) * tile + lax.broadcasted_iota(jnp.int32, w.shape, 0)
        w = jnp.where(row < batch, w, 0.0)
    psum_ref[...] = jnp.sum(w, axis=0, keepdims=True).reshape(1, 1, w_dim)


def _truncation_kernel(w_ref, wavg_ref, out_ref, *, psi, num_styles, w_dim):
    """Standalone truncation for the input_w=True path; lerps per D-wide slice."""
    wavg = wavg_ref[...]                                           # (1, D), resident
    for s in range(num_styles):
        sl = slice(s * w_dim, (s + 1) * w_dim)
        out_ref[:, sl] = (wavg + psi * (w_ref[:, sl] - wavg)).astype(out_ref.dtype)


def _batch_sum_kernel(w0_ref, psum_ref, *, batch, tile, mask_pad):
    """Standalone per-tile batch sum of w[:, 0, :] for the input_w=True train path."""
    w = w0_ref[...].astype(jnp.float32)
    if mask_pad:
        row = pl.program_id(0) * tile + lax.broadcasted_iota(jnp.int32, w.shape, 0)
        w = jnp.where(row < batch, w, 0.0)
    psum_ref[...] = jnp.sum(w, axis=0, keepdims=True).reshape(psum_ref.shape)


# ----------------------------- wrappers -----------------------------------------


def mapping_forward_eval(z, w1, b1, w2, b2, w_avg, num_styles, psi,
                         mxu_dtype=jnp.float32):
    """Fused mapping MLP + truncation; returns style codes (B, N, D)."""
    B, Z = z.shape
    H = w1.shape[1]
    D = w2.shape[1]
    slab = num_styles * D
    psi = float(psi)
    use_trunc = psi != 1.0

    fixed = 2 * 4 * (Z * H + H + H * D + 2 * D)          # resident weight buffers
    tb = _choose_batch_tile(B, 4 * (Z + slab), fixed)
    Bp = pl.cdiv(B, tb) * tb
    zp = _pad_rows(z, Bp)

    kernel = functools.partial(_mapping_eval_kernel, psi=psi, num_styles=num_styles,
                               w_dim=D, mxu_dtype=mxu_dtype)
    # TODO(synk): weights could be single-buffered (pipeline_mode=pl.Buffered(1))
    # for extra VMEM headroom on v7x; left default for portability.
    in_specs = [
        pl.BlockSpec((tb, Z), lambda i: (i, 0)),          # batch tile of z
        pl.BlockSpec((Z, H), lambda i: (0, 0)),           # weights stay resident
        pl.BlockSpec((1, H), lambda i: (0, 0)),
        pl.BlockSpec((H, D), lambda i: (0, 0)),
        pl.BlockSpec((1, D), lambda i: (0, 0)),
    ]
    args = [zp, w1, b1, w2, b2]
    if use_trunc:                                         # only DMA w_avg when needed
        in_specs.append(pl.BlockSpec((1, D), lambda i: (0, 0)))
        args.append(w_avg)

    w_flat = pl.pallas_call(
        kernel,
        out_shape=jax.ShapeDtypeStruct((Bp, slab), jnp.float32),
        grid_spec=pltpu.PrefetchScalarGridSpec(
            num_scalar_prefetch=0,
            grid=(Bp // tb,),
            in_specs=in_specs,
            out_specs=pl.BlockSpec((tb, slab), lambda i: (i, 0)),
        ),
        compiler_params=pltpu.CompilerParams(
            dimension_semantics=("parallel",),
            vmem_limit_bytes=_vmem_limit_bytes()),
    )(*args)
    if Bp != B:
        w_flat = w_flat[:B]
    return w_flat.reshape(B, num_styles, D)


def mapping_forward_train(z, w1, b1, w2, b2, w_avg, num_styles, decay,
                          mxu_dtype=jnp.float32):
    """Fused mapping MLP + per-tile batch sums; w_avg lerp done on (1, D) in JAX."""
    B, Z = z.shape
    H = w1.shape[1]
    D = w2.shape[1]
    slab = num_styles * D

    fixed = 2 * 4 * (Z * H + H + H * D + D)
    tb = _choose_batch_tile(B, 4 * (Z + slab), fixed)
    Bp = pl.cdiv(B, tb) * tb
    n_tiles = Bp // tb
    zp = _pad_rows(z, Bp)

    kernel = functools.partial(_mapping_train_kernel, num_styles=num_styles, w_dim=D,
                               batch=B, tile=tb, mask_pad=(Bp != B),
                               mxu_dtype=mxu_dtype)
    w_flat, psum = pl.pallas_call(
        kernel,
        out_shape=(
            jax.ShapeDtypeStruct((Bp, slab), jnp.float32),
            jax.ShapeDtypeStruct((n_tiles, 1, D), jnp.float32),
        ),
        grid_spec=pltpu.PrefetchScalarGridSpec(
            num_scalar_prefetch=0,
            grid=(n_tiles,),
            in_specs=[
                pl.BlockSpec((tb, Z), lambda i: (i, 0)),
                pl.BlockSpec((Z, H), lambda i: (0, 0)),
                pl.BlockSpec((1, H), lambda i: (0, 0)),
                pl.BlockSpec((H, D), lambda i: (0, 0)),
                pl.BlockSpec((1, D), lambda i: (0, 0)),
            ],
            out_specs=(
                pl.BlockSpec((tb, slab), lambda i: (i, 0)),
                pl.BlockSpec((1, 1, D), lambda i: (i, 0, 0)),
            ),
        ),
        compiler_params=pltpu.CompilerParams(
            dimension_semantics=("parallel",),      # distinct output blocks per step
            vmem_limit_bytes=_vmem_limit_bytes()),
    )(zp, w1, b1, w2, b2)
    if Bp != B:
        w_flat = w_flat[:B]
    batch_mean = jnp.sum(psum, axis=(0, 1))[None, :] / B            # (1, D), tiny
    new_w_avg = (w_avg + (1.0 - decay) * (batch_mean - w_avg)).astype(w_avg.dtype)
    return w_flat.reshape(B, num_styles, D), new_w_avg


def truncation_trick(w_styles, w_avg, psi):
    """Standalone truncation for externally provided w (input_w=True); batch-tiled."""
    psi = float(psi)
    if psi == 1.0:
        return w_styles
    B, N, D = w_styles.shape
    slab = N * D
    w_flat = w_styles.reshape(B, slab)                 # metadata-only reshape
    tb = _choose_batch_tile(B, 4 * 2 * slab)           # in + out rows, double-buffered
    Bp = pl.cdiv(B, tb) * tb
    wp = _pad_rows(w_flat, Bp)

    kernel = functools.partial(_truncation_kernel, psi=psi, num_styles=N, w_dim=D)
    out = pl.pallas_call(
        kernel,
        out_shape=jax.ShapeDtypeStruct((Bp, slab), w_flat.dtype),
        grid_spec=pltpu.PrefetchScalarGridSpec(
            num_scalar_prefetch=0,
            grid=(Bp // tb,),
            in_specs=[pl.BlockSpec((tb, slab), lambda i: (i, 0)),
                      pl.BlockSpec((1, D), lambda i: (0, 0))],
            out_specs=pl.BlockSpec((tb, slab), lambda i: (i, 0)),
        ),
        compiler_params=pltpu.CompilerParams(
            dimension_semantics=("parallel",),
            vmem_limit_bytes=_vmem_limit_bytes()),
    )(wp, w_avg)
    if Bp != B:
        out = out[:B]
    return out.reshape(B, N, D)


def moving_average_w(w_styles, w_avg, decay):
    """Standalone w_avg update for externally provided w (input_w=True); batch-tiled."""
    B, N, D = w_styles.shape
    w0 = w_styles[:, 0, :]                              # only the first style (matches reference)
    tb = _choose_batch_tile(B, 4 * D)
    Bp = pl.cdiv(B, tb) * tb
    n_tiles = Bp // tb
    w0p = _pad_rows(w0, Bp)

    kernel = functools.partial(_batch_sum_kernel, batch=B, tile=tb, mask_pad=(Bp != B))
    psum = pl.pallas_call(
        kernel,
        out_shape=jax.ShapeDtypeStruct((n_tiles, 1, D), jnp.float32),
        grid_spec=pltpu.PrefetchScalarGridSpec(
            num_scalar_prefetch=0,
            grid=(n_tiles,),
            in_specs=[pl.BlockSpec((tb, D), lambda i: (i, 0))],
            out_specs=pl.BlockSpec((1, 1, D), lambda i: (i, 0, 0)),
        ),
        compiler_params=pltpu.CompilerParams(
            dimension_semantics=("parallel",),
            vmem_limit_bytes=_vmem_limit_bytes()),
    )(w0p)
    batch_mean = jnp.sum(psum, axis=(0, 1))[None, :] / B            # (1, D)
    return (w_avg + (1.0 - decay) * (batch_mean - w_avg)).astype(w_avg.dtype)


# ----------------------------- module --------------------------------------------


class Generator:
    """JAX/Pallas port of the StyleGAN-style Generator template."""

    def __init__(self, z_dim=32, hidden=32, w_dim=32, num_styles=8,
                 w_avg_decay=0.995, mxu_dtype=None, key=None):
        key = jax.random.PRNGKey(42) if key is None else key
        k1, k2 = jax.random.split(key)
        # concrete mapping-MLP weights (base class default is Identity)
        self.w1 = jax.random.normal(k1, (z_dim, hidden), jnp.float32) / jnp.sqrt(z_dim)
        self.b1 = jnp.zeros((1, hidden), jnp.float32)
        self.w2 = jax.random.normal(k2, (hidden, w_dim), jnp.float32) / jnp.sqrt(hidden)
        self.b2 = jnp.zeros((1, w_dim), jnp.float32)
        self.num_styles = num_styles                     # synthesis_network.num_styles
        self.in_ch = w_dim                               # synthesis_network.in_ch
        self.w_avg = jnp.zeros((1, w_dim), jnp.float32)  # registered buffer
        self.w_avg_decay = w_avg_decay
        # bf16 MXU operands at production sizes (z=hidden=w=512), f32 at tiny sizes.
        self.mxu_dtype = (_default_mxu_dtype(z_dim, hidden, w_dim)
                          if mxu_dtype is None else mxu_dtype)

    def forward(self, z, angle=None, style_mixing=False, truncation_psi=1.0,
                input_w=False, training=False):
        # truncation_psi / decay are static Python floats (as in the PyTorch API);
        # they are baked into the kernels at trace time.
        truncation_psi = float(truncation_psi)
        new_w_avg = None

        if input_w:
            w = z                                        # already (B, N, D)
            assert w.ndim == 3
            if training:
                new_w_avg = moving_average_w(w, self.w_avg, self.w_avg_decay)
            elif truncation_psi != 1.0:
                w = truncation_trick(w, self.w_avg, truncation_psi)
        else:
            # TODO(synk): style_mixing branch (python random.randint + torch.randn_like
            # with data-dependent stacking) is not translated.
            if training:
                w, new_w_avg = mapping_forward_train(
                    z, self.w1, self.b1, self.w2, self.b2, self.w_avg,
                    self.num_styles, self.w_avg_decay, self.mxu_dtype)
            else:
                w = mapping_forward_eval(
                    z, self.w1, self.b1, self.w2, self.b2, self.w_avg,
                    self.num_styles, truncation_psi, self.mxu_dtype)
        assert w.ndim == 3

        o = {}
        if new_w_avg is not None:
            # Functional state return (safe under jit); the eager attribute update
            # below is a convenience mirroring the PyTorch buffer mutation.
            o["w_avg"] = new_w_avg
            self.w_avg = new_w_avg

        # TODO(synk): forward_synthesis raises NotImplementedError in the base class
        # (abstract template) and measurement_model defaults to nn.Identity, so the
        # output dict carries only the style codes `w` (+ the updated w_avg state).
        o["w"] = w
        o = self.forward_measurement(o)
        return o

    def forward_measurement(self, x):
        return x  # nn.Identity


# ----------------------------- demo -----------------------------------------------


if __name__ == "__main__":
    gen = Generator(z_dim=32, hidden=32, w_dim=32, num_styles=8)

    key = jax.random.PRNGKey(0)
    z = jax.random.normal(key, (2, 32), jnp.float32)     # latent codes (B, Z)

    # pure-JAX mapping reference (for numerical checks)
    def ref_mapping(zz):
        h = zz @ gen.w1 + gen.b1
        h = jnp.where(h >= 0, h, NEG_SLOPE * h)
        return h @ gen.w2 + gen.b2

    w_ref = ref_mapping(z)                               # (2, 32)

    # eval path: fused mapping + truncation kernel (w_avg is zeros -> w = psi * w_ref)
    out_eval = gen.forward(z, truncation_psi=0.7, training=False)
    jax.block_until_ready(out_eval["w"])
    assert out_eval["w"].shape == (2, 8, 32)
    assert out_eval["w"].dtype == jnp.float32
    assert jnp.allclose(out_eval["w"],
                        jnp.broadcast_to((0.7 * w_ref)[:, None, :], (2, 8, 32)),
                        atol=1e-4)

    # eval path with psi == 1.0 (w_avg dropped from the kernel argument list)
    out_eval1 = gen.forward(z, truncation_psi=1.0, training=False)
    jax.block_until_ready(out_eval1["w"])
    assert jnp.allclose(out_eval1["w"],
                        jnp.broadcast_to(w_ref[:, None, :], (2, 8, 32)), atol=1e-4)

    # training path: fused mapping + per-tile batch-sum kernel, tiny lerp in JAX
    out_train = gen.forward(z, training=True)
    jax.block_until_ready(out_train["w"])
    jax.block_until_ready(gen.w_avg)
    assert out_train["w"].shape == (2, 8, 32)
    assert gen.w_avg.shape == (1, 32)
    expected_w_avg = (1.0 - gen.w_avg_decay) * jnp.mean(w_ref, axis=0, keepdims=True)
    assert jnp.allclose(gen.w_avg, expected_w_avg, atol=1e-5)

    # input_w=True paths: standalone batch-tiled truncation / moving-average kernels
    w_in = out_eval1["w"]
    out_w_eval = gen.forward(w_in, truncation_psi=0.5, input_w=True, training=False)
    jax.block_until_ready(out_w_eval["w"])
    assert out_w_eval["w"].shape == (2, 8, 32)
    out_w_train = gen.forward(w_in, input_w=True, training=True)
    jax.block_until_ready(gen.w_avg)

    print("KERNEL_OK")
</pallas_src>

<mosaic_0001>
module attributes {stable_mosaic.version = 11 : i64} {
  func.func @_mapping_eval_kernel(%arg0: i32, %arg1: memref<2x32xf32, #tpu.memory_space<vmem>>, %arg2: memref<32x32xf32, #tpu.memory_space<vmem>>, %arg3: memref<1x32xf32, #tpu.memory_space<vmem>>, %arg4: memref<32x32xf32, #tpu.memory_space<vmem>>, %arg5: memref<1x32xf32, #tpu.memory_space<vmem>>, %arg6: memref<1x32xf32, #tpu.memory_space<vmem>>, %arg7: memref<2x256xf32, #tpu.memory_space<vmem>>) attributes {dimension_semantics = [#tpu.dimension_semantics<parallel>], iteration_bounds = array<i64: 1>, scalar_prefetch = 0 : i64, scratch_operands = 0 : i64, tpu.core_type = #tpu.core_type<tc>, window_params = [{transform_indices = @transform_0, window_bounds = array<i64: 2, 32>}, {pipeline_mode = #tpu.pipeline_mode<synchronous>, transform_indices = @transform_1, window_bounds = array<i64: 32, 32>}, {pipeline_mode = #tpu.pipeline_mode<synchronous>, transform_indices = @transform_2, window_bounds = array<i64: 1, 32>}, {pipeline_mode = #tpu.pipeline_mode<synchronous>, transform_indices = @transform_3, window_bounds = array<i64: 32, 32>}, {pipeline_mode = #tpu.pipeline_mode<synchronous>, transform_indices = @transform_4, window_bounds = array<i64: 1, 32>}, {pipeline_mode = #tpu.pipeline_mode<synchronous>, transform_indices = @transform_5, window_bounds = array<i64: 1, 32>}, {transform_indices = @transform_6, window_bounds = array<i64: 2, 256>}]} {
    %c0 = arith.constant 0 : index
    %c0_0 = arith.constant 0 : index
    %0 = vector.load %arg1[%c0, %c0_0] : memref<2x32xf32, #tpu.memory_space<vmem>>, vector<2x32xf32>
    %c0_1 = arith.constant 0 : index
    %c0_2 = arith.constant 0 : index
    %1 = vector.load %arg2[%c0_1, %c0_2] : memref<32x32xf32, #tpu.memory_space<vmem>>, vector<32x32xf32>
    %c0_3 = arith.constant 0 : index
    %c0_4 = arith.constant 0 : index
    %2 = vector.load %arg3[%c0_3, %c0_4] : memref<1x32xf32, #tpu.memory_space<vmem>>, vector<1x32xf32>
    %c0_5 = arith.constant 0 : index
    %c0_6 = arith.constant 0 : index
    %3 = vector.load %arg4[%c0_5, %c0_6] : memref<32x32xf32, #tpu.memory_space<vmem>>, vector<32x32xf32>
    %c0_7 = arith.constant 0 : index
    %c0_8 = arith.constant 0 : index
    %4 = vector.load %arg5[%c0_7, %c0_8] : memref<1x32xf32, #tpu.memory_space<vmem>>, vector<1x32xf32>
    %cst = arith.constant dense<0.000000e+00> : vector<2x32xf32>
    %5 = tpu.matmul %0, %1, %cst {dimension_numbers = #tpu.dot_dimension_numbers<[1], [0], [0], [1], [0, 0, 1, 1], [], []>} : vector<2x32xf32>, vector<32x32xf32>, vector<2x32xf32> -> vector<2x32xf32>
    %6 = vector.broadcast %2 : vector<1x32xf32> to vector<2x32xf32>
    %7 = arith.addf %5, %6 : vector<2x32xf32>
    %cst_9 = arith.constant 0.000000e+00 : f32
    %8 = vector.broadcast %cst_9 : f32 to vector<2x32xf32>
    %9 = arith.cmpf oge, %7, %8 : vector<2x32xf32>
    %cst_10 = arith.constant 2.000000e-01 : f32
    %10 = vector.broadcast %cst_10 : f32 to vector<2x32xf32>
    %11 = arith.mulf %10, %7 : vector<2x32xf32>
    %12 = arith.select %9, %7, %11 : vector<2x32xi1>, vector<2x32xf32>
    %cst_11 = arith.constant dense<0.000000e+00> : vector<2x32xf32>
    %13 = tpu.matmul %12, %3, %cst_11 {dimension_numbers = #tpu.dot_dimension_numbers<[1], [0], [0], [1], [0, 0, 1, 1], [], []>} : vector<2x32xf32>, vector<32x32xf32>, vector<2x32xf32> -> vector<2x32xf32>
    %14 = vector.broadcast %4 : vector<1x32xf32> to vector<2x32xf32>
    %15 = arith.addf %13, %14 : vector<2x32xf32>
    %c0_12 = arith.constant 0 : index
    %c0_13 = arith.constant 0 : index
    %16 = vector.load %arg6[%c0_12, %c0_13] : memref<1x32xf32, #tpu.memory_space<vmem>>, vector<1x32xf32>
    %17 = vector.broadcast %16 : vector<1x32xf32> to vector<2x32xf32>
    %18 = arith.subf %15, %17 : vector<2x32xf32>
    %cst_14 = arith.constant 0.699999988 : f32
    %19 = vector.broadcast %cst_14 : f32 to vector<2x32xf32>
    %20 = arith.mulf %19, %18 : vector<2x32xf32>
    %21 = vector.broadcast %16 : vector<1x32xf32> to vector<2x32xf32>
    %22 = arith.addf %21, %20 : vector<2x32xf32>
    %c0_15 = arith.constant 0 : index
    %c0_16 = arith.constant 0 : index
    %23 = vector.load %arg7[%c0_15, %c0_16] : memref<2x256xf32, #tpu.memory_space<vmem>>, vector<2x32xf32>
    tpu.vector_store %arg7[%c0_15, %c0_16], %22 {strides = array<i32>} : memref<2x256xf32, #tpu.memory_space<vmem>>, vector<2x32xf32>,
    %c0_17 = arith.constant 0 : index
    %c32 = arith.constant 32 : index
    %24 = vector.load %arg7[%c0_17, %c32] : memref<2x256xf32, #tpu.memory_space<vmem>>, vector<2x32xf32>
    tpu.vector_store %arg7[%c0_17, %c32], %22 {strides = array<i32>} : memref<2x256xf32, #tpu.memory_space<vmem>>, vector<2x32xf32>,
    %c0_18 = arith.constant 0 : index
    %c64 = arith.constant 64 : index
    %25 = vector.load %arg7[%c0_18, %c64] : memref<2x256xf32, #tpu.memory_space<vmem>>, vector<2x32xf32>
    tpu.vector_store %arg7[%c0_18, %c64], %22 {strides = array<i32>} : memref<2x256xf32, #tpu.memory_space<vmem>>, vector<2x32xf32>,
    %c0_19 = arith.constant 0 : index
    %c96 = arith.constant 96 : index
    %26 = vector.load %arg7[%c0_19, %c96] : memref<2x256xf32, #tpu.memory_space<vmem>>, vector<2x32xf32>
    tpu.vector_store %arg7[%c0_19, %c96], %22 {strides = array<i32>} : memref<2x256xf32, #tpu.memory_space<vmem>>, vector<2x32xf32>,
    %c0_20 = arith.constant 0 : index
    %c128 = arith.constant 128 : index
    %27 = vector.load %arg7[%c0_20, %c128] : memref<2x256xf32, #tpu.memory_space<vmem>>, vector<2x32xf32>
    tpu.vector_store %arg7[%c0_20, %c128], %22 {strides = array<i32>} : memref<2x256xf32, #tpu.memory_space<vmem>>, vector<2x32xf32>,
    %c0_21 = arith.constant 0 : index
    %c160 = arith.constant 160 : index
    %28 = vector.load %arg7[%c0_21, %c160] : memref<2x256xf32, #tpu.memory_space<vmem>>, vector<2x32xf32>
    tpu.vector_store %arg7[%c0_21, %c160], %22 {strides = array<i32>} : memref<2x256xf32, #tpu.memory_space<vmem>>, vector<2x32xf32>,
    %c0_22 = arith.constant 0 : index
    %c192 = arith.constant 192 : index
    %29 = vector.load %arg7[%c0_22, %c192] : memref<2x256xf32, #tpu.memory_space<vmem>>, vector<2x32xf32>
    tpu.vector_store %arg7[%c0_22, %c192], %22 {strides = array<i32>} : memref<2x256xf32, #tpu.memory_space<vmem>>, vector<2x32xf32>,
    %c0_23 = arith.constant 0 : index
    %c224 = arith.constant 224 : index
    %30 = vector.load %arg7[%c0_23, %c224] : memref<2x256xf32, #tpu.memory_space<vmem>>, vector<2x32xf32>
    tpu.vector_store %arg7[%c0_23, %c224], %22 {strides = array<i32>} : memref<2x256xf32, #tpu.memory_space<vmem>>, vector<2x32xf32>,
    return
  }
  func.func @transform_0(%arg0: i32) -> (i32, i32) {
    %c0_i32 = arith.constant 0 : i32
    %c0_i32_0 = arith.constant 0 : i32
    return %arg0, %c0_i32 : i32, i32
  }
  func.func @transform_1(%arg0: i32) -> (i32, i32) {
    %c0_i32 = arith.constant 0 : i32
    %c0_i32_0 = arith.constant 0 : i32
    %c0_i32_1 = arith.constant 0 : i32
    return %c0_i32, %c0_i32_0 : i32, i32
  }
  func.func @transform_2(%arg0: i32) -> (i32, i32) {
    %c0_i32 = arith.constant 0 : i32
    %c0_i32_0 = arith.constant 0 : i32
    %c0_i32_1 = arith.constant 0 : i32
    return %c0_i32, %c0_i32_0 : i32, i32
  }
  func.func @transform_3(%arg0: i32) -> (i32, i32) {
    %c0_i32 = arith.constant 0 : i32
    %c0_i32_0 = arith.constant 0 : i32
    %c0_i32_1 = arith.constant 0 : i32
    return %c0_i32, %c0_i32_0 : i32, i32
  }
  func.func @transform_4(%arg0: i32) -> (i32, i32) {
    %c0_i32 = arith.constant 0 : i32
    %c0_i32_0 = arith.constant 0 : i32
    %c0_i32_1 = arith.constant 0 : i32
    return %c0_i32, %c0_i32_0 : i32, i32
  }
  func.func @transform_5(%arg0: i32) -> (i32, i32) {
    %c0_i32 = arith.constant 0 : i32
    %c0_i32_0 = arith.constant 0 : i32
    %c0_i32_1 = arith.constant 0 : i32
    return %c0_i32, %c0_i32_0 : i32, i32
  }
  func.func @transform_6(%arg0: i32) -> (i32, i32) {
    %c0_i32 = arith.constant 0 : i32
    %c0_i32_0 = arith.constant 0 : i32
    return %arg0, %c0_i32 : i32, i32
  }
}

</mosaic_0001>

<bundles_post_ra>
// kernel: tpu_custom_call.1
= control target key start
LH: loop header
LB: loop body
LE: loop exit
PB: predicated region body
PF: predicated region fallthrough
CT: control target
= control target key end

     0   :  { %11 = vsyncpa [#allocation3], 0  ;;  %s558_s0 = inlined_call_operand.hbm [shape: f32[2,32], index: 0, kind: input, shape index: {}]   ;;  %s559_s1 = inlined_call_operand.hbm [shape: f32[32,32], index: 1, kind: input, shape index: {}]   ;;  %s560_s2 = inlined_call_operand.vmem [shape: f32[1,32], index: 2, kind: input, shape index: {}]   ;;  %s561_s3 = inlined_call_operand.hbm [shape: f32[32,32], index: 3, kind: input, shape index: {}]   ;;  %s562_s4 = inlined_call_operand.vmem [shape: f32[1,32], index: 4, kind: input, shape index: {}]   ;;  %s563_s5 = inlined_call_operand.vmem [shape: f32[1,32], index: 5, kind: input, shape index: {}]   ;;  %s564_s6 = inlined_call_operand.hbm [shape: f32[2,256], index: 6, kind: output, shape index: {}]  }
   0x1   :  { %12 = vsyncpa [#allocation6], 0 }
   0x2   :  { %13 = vsyncpa [#allocation4], 0  ;;  %s447_s21 = smov [#allocation5]   ;;  %s353_s25 = scalar_lea.hbm %s559_s1, 512 }
   0x3   :  { %s29_s22 = sshll.u32 %s447_s21, 4  ;;  %p354_p0 = scmp.ne.s32.totalorder %s559_s1, %s353_s25  ;;  %s30_s22 = int_to_ptr.vmem [resolvable:$true] %s29_s22 }
   0x4   :  { %p357_p1 = scmp.lt.u32.totalorder %s353_s25, %s559_s1 }
   0x6   :  { %p359_p2 = pnand %p357_p1, %p354_p0 }
   0x8   :  { %362 = shalt.err (!%p359_p2)
}
   0x9   :  { %s363_s30 = scalar_lea.vmem %s30_s22, 512  ;;  %p368_p4 = scmp.lt.s32.totalorder %s30_s22, %s30_s22 }
   0xa   :  { %p364_p3 = scmp.ne.s32.totalorder %s30_s22, %s363_s30  ;;  %p369_p5 = scmp.lt.s32.totalorder %s363_s30, %s363_s30 }
   0xc   :  { %p370_p6 = por %p369_p5, %p368_p4 }
   0xe   :  { %p371_p7 = pnand %p370_p6, %p364_p3 }
  0x10   :  { %374 = shalt.err (!%p371_p7)
}
  0x11   :  { %s448_s7 = smov 128   ;;  %s449_s8 = smov 8  }
  0x12   :  { %35 = dma.hbm_to_vmem [thread:$0]  %s559_s1, 512, %s30_s22, [#allocation6], %s448_s7, %s448_s7, %s449_s8  }
  0x13   :  { %s450_s11 = smov [#allocation2]   ;;  %s451_s13 = smov [#allocation7]  }
  0x14   :  { %s20_s12 = sshll.u32 %s450_s11, 4  ;;  %s43_s14 = sshll.u32 %s451_s13, 4  ;;  %s21_s12 = int_to_ptr.vmem [resolvable:$true] %s20_s12  ;;  %s44_s14 = int_to_ptr.vmem [resolvable:$true] %s43_s14 }
  0x15   :  { %s375_s17 = scalar_lea.hbm %s558_s0, 32 }
  0x16   :  { %p376_p8 = scmp.ne.s32.totalorder %s558_s0, %s375_s17  ;;  %p379_p9 = scmp.lt.u32.totalorder %s375_s17, %s558_s0 }
  0x18   :  { %p381_p10 = pnand %p379_p9, %p376_p8 }
  0x1a   :  { %384 = shalt.err (!%p381_p10)
}
  0x1b   :  { %s385_s1 = scalar_lea.vmem %s21_s12, 32  ;;  %p390_p12 = scmp.lt.s32.totalorder %s21_s12, %s21_s12 }
  0x1c   :  { %p386_p11 = scmp.ne.s32.totalorder %s21_s12, %s385_s1  ;;  %p391_p13 = scmp.lt.s32.totalorder %s385_s1, %s385_s1 }
  0x1e   :  { %p392_p0 = por %p391_p13, %p390_p12 }
  0x20   :  { %p393_p1 = pnand %p392_p0, %p386_p11 }
  0x22   :  { %396 = shalt.err (!%p393_p1)
}
  0x23   :  { %23 = dma.hbm_to_vmem [thread:$0]  %s558_s0, 32, %s21_s12, [#allocation3]  }
  0x24   :  { %s397_s26 = scalar_lea.hbm %s561_s3, 512 }
  0x25   :  { %p398_p2 = scmp.ne.s32.totalorder %s561_s3, %s397_s26  ;;  %p401_p3 = scmp.lt.u32.totalorder %s397_s26, %s561_s3 }
  0x27   :  { %p403_p4 = pnand %p401_p3, %p398_p2 }
  0x29   :  { %406 = shalt.err (!%p403_p4)
}
  0x2a   :  { %s407_s9 = scalar_lea.vmem %s44_s14, 512  ;;  %p412_p6 = scmp.lt.s32.totalorder %s44_s14, %s44_s14 }
  0x2b   :  { %p408_p5 = scmp.ne.s32.totalorder %s44_s14, %s407_s9  ;;  %p413_p7 = scmp.lt.s32.totalorder %s407_s9, %s407_s9 }
  0x2d   :  { %p414_p8 = por %p413_p7, %p412_p6 }
  0x2f   :  { %p415_p9 = pnand %p414_p8, %p408_p5 }
  0x31   :  { %418 = shalt.err (!%p415_p9)
}
  0x32   :  { %49 = dma.hbm_to_vmem [thread:$0]  %s561_s3, 512, %s44_s14, [#allocation6], %s448_s7, %s448_s7, %s449_s8  }
  0x33   :  { %441 = dma.done.wait [#allocation3], 32  }
  0x34   :  { %442 = vsyncadd [#allocation3], 4294967264 }
  0x35   :  { %443 = dma.done.wait [#allocation6], 1024  }
  0x36   :  { %444 = vsyncadd [#allocation6], 4294966272  ;;  %v452_v0 = vmov 0.0|0.0   ;;  %vm453_vm0 = vmmov 0   ;;  %v454_v1 = vmov 0.0   ;;  %v64_v2 = vld [vmem:[#allocation5] sm:$0xff]  ;;  %v252_v23 = vlaneseq }
  0x37   :  { %328 = vmatprep.subr.bf16.mxu0 %v452_v0  ;;  %314 = vmatprep.mubr.msk.f32.mxu0 %vm453_vm0, %v454_v1  ;;  %v65_v3 = vld [vmem:[#allocation5 + $0x8] sm:$0xff]  ;;  %v66_v4 = vld [vmem:[#allocation5 + $0x10] sm:$0xff]  ;;  %v67_v6 = vld [vmem:[#allocation5 + $0x18] sm:$0xff]  ;;  %vm80_vm1 = vcmask 261120   ;;  %v455_v21 = vmov 1983009808  }
  0x38   :  { %334 = vmatprep.subr.bf16.mxu1 %v452_v0  ;;  %325 = vmatprep.mubr.msk.f32.mxu1 %vm453_vm0, %v454_v1  ;;  %v329_v5 = vpack.c.bf16 %v65_v3, %v64_v2  ;;  %v69_v7 = vld [vmem:[#allocation7] sm:$0xff]  ;;  %v70_v8 = vld [vmem:[#allocation7 + $0x8] sm:$0xff]  ;;  %v332_v9 = vpack.c.bf16 %v67_v6, %v66_v4  ;;  %v63_v11 = vld [vmem:[#allocation2] sm:$0x3]  ;;  %v250_v22 = vunpack.c.l.s4 %v455_v21  ;;  %v253_v30 = vshrl.u32 %v252_v23, 7  ;;  %s458_s14 = smov 64  }
  0x39   :  { %v335_v10 = vpack.c.bf16 %v70_v8, %v69_v7  ;;  %v71_v12 = vld [vmem:[#allocation7 + $0x10] sm:$0xff]  ;;  %v72_v13 = vld [vmem:[#allocation7 + $0x18] sm:$0xff]  ;;  %vm246_vm3 = vcmask 254976   ;;  %vm259_vm4 = vcmask 517376   ;;  %vm264_vm5 = vcmask 779776  }
  0x3a   :  { %330 = vmatpush3.bf16.msra.mxu0 %v329_v5  ;;  %v338_v14 = vpack.c.bf16 %v72_v13, %v71_v12  ;;  %v291_v15 = vld [vmem:[%s560_s2] ss:$0 sm:$0xff]  ;;  %v251_v29 = vunpack.c.0.s8 %v250_v22  ;;  %s456_s2 = smov 96   ;;  %vm269_vm6 = vcmask 1042176  }
  0x3b   :  { %331 = vmatprep.subr.bf16.mxu0 %v452_v0  ;;  %336 = vmatpush3.bf16.msra.mxu1 %v335_v10  ;;  %v293_v24 = vld [vmem:[%s562_s4] ss:$0 sm:$0xff]  ;;  %s457_s4 = smov 32  }
  0x3c   :  { %337 = vmatprep.subr.bf16.mxu1 %v452_v0  ;;  %v295_v26 = vld [vmem:[%s563_s5] ss:$0 sm:$0xff]  ;;  %v254_v33 = vsub.s32 %v251_v29, %v253_v30  ;;  %s459_s5 = smov [#allocation8]  }
  0x3d   :  { %s281_s15 = sshll.u32 %s459_s5, 4  ;;  %s282_s15 = int_to_ptr.vmem [resolvable:$true] %s281_s15 }
  0x3e   :  { %333 = vmatpush3.bf16.msra.mxu0 %v332_v9  ;;  %s419_s16 = scalar_lea.vmem %s282_s15, 64  ;;  %p424_p11 = scmp.lt.s32.totalorder %s282_s15, %s282_s15 }
  0x3f   :  { %339 = vmatpush3.bf16.msra.mxu1 %v338_v14  ;;  %p420_p10 = scmp.ne.s32.totalorder %s282_s15, %s419_s16  ;;  %p425_p12 = scmp.lt.s32.totalorder %s419_s16, %s419_s16 }
  0x41   :  { %315 = vmatmul.mubr.msk.f32.vlgmr.msra.gmra.mrb[0].mxu0 %vm80_vm1, %v63_v11  ;;  %p426_p13 = por %p425_p12, %p424_p11 }
  0x43   :  { %p427_p0 = pnand %p426_p13, %p420_p10 }
 0x114   :  { %v150_v16 = vpop.f32.mrb[0].mxu0 }
 0x115   :  { %v151_v17 = vadd.f32 %v291_v15, %v150_v16  ;;  %v316_v18 = vpop.f32.mrb[1].mxu0 }
 0x117   :  { %vm154_vm2 = vcmp.ge.f32.partialorder %v151_v17, 0.0  ;;  %v155_v19 = vmul.f32 0.2, %v151_v17 }
 0x119   :  { %v156_v20 = vsel %vm154_vm2, %v151_v17, %v155_v19 }
 0x11a   :  { %326 = vmatmul.mubr.msk.f32.vlgmr.msra.gmra.mrb[0].mxu1 %vm80_vm1, %v156_v20 }
 0x1ed   :  { %v232_v25 = vpop.f32.mrb[0].mxu1 }
 0x1ee   :  { %v233_v27 = vadd.f32 %v293_v24, %v232_v25  ;;  %v327_v28 = vpop.f32.mrb[1].mxu1 }
 0x1f0   :  { %v243_v31 = vsub.f32 %v233_v27, %v295_v26 }
 0x1f2   :  { %v244_v32 = vmul.f32 0.7, %v243_v31 }
 0x1f4   :  { %v245_v34 = vadd.f32 %v295_v26, %v244_v32 }
 0x1f6   :  { %v255_v35 = vrot.slane %v245_v34, %v254_v33  ;;  %271 = vst.msk [vmem:[#allocation8 + $0x2] sm:$0x3] %vm246_vm3, %v245_v34  ;;  %247 = vst.msk [vmem:[#allocation8] sm:$0x3] %vm246_vm3, %v245_v34 }
 0x1f8   :  { %266 = vrot.lane.b32.xlu1 %v255_v35, %s456_s2  ;;  %256 = vrot.lane.b32.xlu0 %v255_v35, %s457_s4 }
 0x1fc   :  { %261 = vrot.lane.b32.xlu0 %v255_v35, %s458_s14 }
 0x26a   :  { %v257_v36 = vpop.permute.xlu0 %256  ;;  %v267_v38 = vpop.permute.xlu1 %266 }
 0x26b   :  { %260 = vst.msk [vmem:[#allocation8] sm:$0x3] %vm259_vm4, %v257_v36  ;;  %272 = vst.msk [vmem:[#allocation8 + $0x2] sm:$0x3] %vm259_vm4, %v257_v36 }
 0x26e   :  { %v262_v37 = vpop.permute.xlu0 %261 }
 0x26f   :  { %265 = vst.msk [vmem:[#allocation8] sm:$0x3] %vm264_vm5, %v262_v37  ;;  %273 = vst.msk [vmem:[#allocation8 + $0x2] sm:$0x3] %vm264_vm5, %v262_v37 }
 0x270   :  { %270 = vst.msk [vmem:[#allocation8] sm:$0x3] %vm269_vm6, %v267_v38  ;;  %274 = vst.msk [vmem:[#allocation8 + $0x2] sm:$0x3] %vm269_vm6, %v267_v38 }
 0x271   :  { %430 = shalt.err (!%p427_p0)
}
 0x272   :  { %s431_s19 = scalar_lea.hbm %s564_s6, 64 }
 0x273   :  { %p432_p1 = scmp.ne.s32.totalorder %s564_s6, %s431_s19  ;;  %p435_p2 = scmp.lt.u32.totalorder %s431_s19, %s564_s6 }
 0x275   :  { %p437_p3 = pnand %p435_p2, %p432_p1 }
 0x277   :  { %440 = shalt.err (!%p437_p3)
}
 0x278   :  { %284 = dma.vmem_to_hbm [thread:$0]  %s282_s15, 64, %s564_s6, [#allocation4]  }
 0x279   :  { %445 = dma.done.wait [#allocation4], 64  }
 0x27a   :  { %446 = vsyncadd [#allocation4], 4294967232 }
 0x27b   :  { %288 = vsyncpa [#allocation3], 1 }
 0x27c   :  { %289 = vsyncpa [#allocation6], 1 }
 0x27d   :  { %290 = vsyncpa [#allocation4], 1 }

</bundles_post_ra>
